<compile_context>
chip_gen: v7x
topology: tpu7x:2x2x1
jax: 0.10.0
libtpu: 0.0.40
codegen_flags: <defaults>
</compile_context>

<pallas_src>
import math
from typing import NamedTuple

import jax
import jax.numpy as jnp
from jax.experimental import pallas as pl
from jax.experimental.pallas import tpu as pltpu


# --------------------------------------------------------------------------
# helpers
# --------------------------------------------------------------------------
def _round_up(x: int, m: int) -> int:
    return ((x + m - 1) // m) * m


def _sublane_multiple(dtype) -> int:
    # f32 -> 8 sublanes per vreg row-group; bf16 packs 16; int8 packs 32.
    return max(8, 32 // jnp.dtype(dtype).itemsize)


def _choose_tile(dim: int, max_tile: int, align: int) -> tuple[int, int]:
    """Pick a tile (multiple of `align`, <= max_tile) that minimizes the padded
    size of `dim`; prefer 256-multiples on ties (full v6e/v7x MXU width).
    Returns (tile, padded_dim)."""
    dim_r = _round_up(max(dim, 1), align)
    max_tile = max(align, (max_tile // align) * align)  # re-align user override
    if dim_r <= max_tile:
        return dim_r, dim_r
    cands = list(range(align, max_tile + 1, align))
    min_pad = min(_round_up(dim_r, t) for t in cands)
    best = [t for t in cands if _round_up(dim_r, t) == min_pad]
    best256 = [t for t in best if t % 256 == 0]
    tile = max(best256) if best256 else max(best)
    return tile, _round_up(dim_r, tile)


def _vmem_limit_bytes(tile_plan_bytes: int) -> int:
    """Generation-aware VMEM limit: ask for what the tile plan needs (x2 for
    slack), capped at ~80% of physical VMEM so the compiler keeps headroom
    (critical on v7x's 64 MiB per TensorCore)."""
    phys = 128 << 20
    try:
        info = pltpu.get_tpu_info()
        phys = int(getattr(info, "vmem_capacity_bytes", phys)) or phys
    except Exception:  # pragma: no cover - CPU interpret / old runtimes
        pass
    cap = int(phys * 0.8)
    want = max(2 * tile_plan_bytes, 32 << 20)
    return int(min(want, cap))


# --------------------------------------------------------------------------
# kernels
# --------------------------------------------------------------------------
def _linear_kernel_f32(x_ref, w_ref, o_ref):
    """f32 output: accumulate directly into the resident output block (its
    BlockSpec maps to the same (i, j) tile for every k step)."""
    @pl.when(pl.program_id(2) == 0)
    def _():
        o_ref[...] = jnp.zeros_like(o_ref)

    o_ref[...] += jnp.dot(x_ref[...], w_ref[...],
                          preferred_element_type=jnp.float32)


def _linear_kernel_acc(x_ref, w_ref, o_ref, acc_ref):
    """Narrow output dtypes (bf16/...): accumulate in an f32 VMEM scratch and
    cast once on the last k step."""
    k_step = pl.program_id(2)

    @pl.when(k_step == 0)
    def _():
        acc_ref[...] = jnp.zeros_like(acc_ref)

    acc_ref[...] += jnp.dot(x_ref[...], w_ref[...],
                            preferred_element_type=jnp.float32)

    @pl.when(k_step == pl.num_programs(2) - 1)
    def _():
        o_ref[...] = acc_ref[...].astype(o_ref.dtype)


# --------------------------------------------------------------------------
# weight preparation (one-time, out of the forward hot path)
# --------------------------------------------------------------------------
class PreparedWeight(NamedTuple):
    w_kn: jax.Array        # (k_pad, n_pad): transposed + zero-padded weight
    in_features: int
    out_features: int
    k_pad: int
    n_pad: int
    tk: int
    tn: int


def prepare_weight(weight: jax.Array, *, tn_max: int = 1024,
                   tk_max: int = 1024) -> PreparedWeight:
    """One-time prep of a PyTorch-layout (out_features, in_features) weight into
    the MXU-native (K_pad, N_pad) RHS.  Do this once per parameter (init /
    param update), NOT per forward call: the transpose+pad is 1-2 full HBM
    passes over the weight."""
    out_features, in_features = weight.shape
    tk, k_pad = _choose_tile(in_features, tk_max, 128)
    tn, n_pad = _choose_tile(out_features, tn_max, 128)
    w_kn = weight.T
    if (k_pad, n_pad) != (in_features, out_features):
        w_kn = jnp.pad(w_kn, ((0, k_pad - in_features),
                              (0, n_pad - out_features)))
    return PreparedWeight(w_kn, in_features, out_features, k_pad, n_pad, tk, tn)


# --------------------------------------------------------------------------
# forward
# --------------------------------------------------------------------------
def linear_forward(x: jax.Array, w: PreparedWeight, *, tm_max: int = 512,
                   out_dtype=None) -> jax.Array:
    """y = x @ weight.T, matching torch.nn.Linear (no bias).

    x: (..., in_features); w: PreparedWeight (see prepare_weight).
    Returns (..., out_features) in out_dtype (default: x.dtype)."""
    assert x.shape[-1] == w.in_features
    out_dtype = jnp.dtype(out_dtype or x.dtype)

    leading = x.shape[:-1]
    m = int(math.prod(leading)) if leading else 1
    k, n = w.in_features, w.out_features
    k_pad, n_pad, tk, tn = w.k_pad, w.n_pad, w.tk, w.tn

    sub_m = _sublane_multiple(x.dtype)
    tm, m_pad = _choose_tile(m, tm_max, sub_m)

    # Keep >=2 blocks on a parallel axis for large single-tile problems so a
    # 2-TensorCore chip (v7x) can shard the grid; one extra step is noise.
    if m_pad == tm and n_pad == tn and m_pad * n_pad >= 256 * 256:
        if n_pad % 256 == 0:
            tn = n_pad // 2
        elif n_pad > 128:
            tn = 128

    x2d = x.reshape(m, k)
    if (m_pad, k_pad) != (m, k):
        x2d = jnp.pad(x2d, ((0, m_pad - m), (0, k_pad - k)))

    grid = (m_pad // tm, n_pad // tn, k_pad // tk)

    itm_x = jnp.dtype(x.dtype).itemsize
    itm_w = jnp.dtype(w.w_kn.dtype).itemsize
    itm_o = out_dtype.itemsize
    use_scratch = out_dtype != jnp.float32
    tile_bytes = (2 * (tm * tk * itm_x + tk * tn * itm_w + tm * tn * itm_o)
                  + (tm * tn * 4 if use_scratch else 0))

    cost = pl.CostEstimate(
        flops=2 * m_pad * n_pad * k_pad,
        transcendentals=0,
        bytes_accessed=(m_pad * k_pad * itm_x * (n_pad // tn)
                        + k_pad * n_pad * itm_w * (m_pad // tm)
                        + m_pad * n_pad * itm_o),
    )

    kernel = _linear_kernel_acc if use_scratch else _linear_kernel_f32
    scratch = [pltpu.VMEM((tm, tn), jnp.float32)] if use_scratch else []

    y2d = pl.pallas_call(
        kernel,
        out_shape=jax.ShapeDtypeStruct((m_pad, n_pad), out_dtype),
        grid_spec=pltpu.PrefetchScalarGridSpec(
            num_scalar_prefetch=0,
            grid=grid,
            in_specs=[
                pl.BlockSpec((tm, tk), lambda i, j, kk: (i, kk)),
                pl.BlockSpec((tk, tn), lambda i, j, kk: (kk, j)),
            ],
            out_specs=pl.BlockSpec((tm, tn), lambda i, j, kk: (i, j)),
            scratch_shapes=scratch,
        ),
        compiler_params=pltpu.CompilerParams(
            dimension_semantics=("parallel", "parallel", "arbitrary"),
            vmem_limit_bytes=_vmem_limit_bytes(tile_bytes),
        ),
        cost_estimate=cost,
    )(x2d, w.w_kn)

    if (m_pad, n_pad) != (m, n):
        y2d = y2d[:m, :n]
    return y2d.reshape(*leading, n)


def linear_forward_torch_layout(x: jax.Array, weight: jax.Array, *,
                                tm_max: int = 512, tn_max: int = 1024,
                                tk_max: int = 1024, out_dtype=None) -> jax.Array:
    """Convenience path taking the raw (out, in) PyTorch-layout weight.  Pays
    the weight transpose+pad HBM passes per call -- prefer prepare_weight() +
    linear_forward() in real use."""
    return linear_forward(x, prepare_weight(weight, tn_max=tn_max, tk_max=tk_max),
                          tm_max=tm_max, out_dtype=out_dtype)


def init_linear_weight(key, in_features: int, out_features: int,
                       dtype=jnp.float32) -> jax.Array:
    """Truncated-normal init matching nn.init.trunc_normal_(0, std, -3std, 3std)."""
    std = math.sqrt(2.0 / (in_features + out_features))
    w = jax.random.truncated_normal(
        key, lower=-3.0, upper=3.0, shape=(out_features, in_features),
        dtype=jnp.float32) * std
    return w.astype(dtype)


# --------------------------------------------------------------------------
# self-test
# --------------------------------------------------------------------------
if __name__ == "__main__":
    key = jax.random.PRNGKey(0)
    k_w1, k_x1, k_w2, k_x2, k_w3, k_x3 = jax.random.split(key, 6)

    # --- Test 1: module-implied small shapes (single-tile grid, f32 path).
    batch, seq = 2, 8
    in_features, out_features = 32, 64
    weight = init_linear_weight(k_w1, in_features, out_features)
    w_prep = prepare_weight(weight)                       # one-time prep
    x = jax.random.normal(k_x1, (batch, seq, in_features), dtype=jnp.float32)

    y = linear_forward(x, w_prep)
    jax.block_until_ready(y)
    y_ref = jnp.einsum("bsi,oi->bso", x, weight)
    assert y.shape == (batch, seq, out_features)
    assert jnp.allclose(y, y_ref, atol=1e-4, rtol=1e-4)

    # --- Test 2: small tiles forced so the 3-D grid + K-accumulation path
    # (pl.when init over multiple k steps, direct-into-o_ref f32 accumulator)
    # is actually exercised.
    in2, out2 = 256, 256
    weight2 = init_linear_weight(k_w2, in2, out2)
    w2_prep = prepare_weight(weight2, tn_max=128, tk_max=128)
    x2 = jax.random.normal(k_x2, (2, 16, in2), dtype=jnp.float32)

    y2 = linear_forward(x2, w2_prep, tm_max=16)
    jax.block_until_ready(y2)
    y2_ref = jnp.einsum("bsi,oi->bso", x2, weight2)
    assert y2.shape == (2, 16, out2)
    assert jnp.allclose(y2, y2_ref, atol=1e-4, rtol=1e-4)

    # --- Test 3: bf16 inputs/outputs -> exercises the f32-scratch accumulator
    # kernel and the torch-layout convenience wrapper.
    in3, out3 = 256, 128
    weight3 = init_linear_weight(k_w3, in3, out3, dtype=jnp.bfloat16)
    x3 = jax.random.normal(k_x3, (4, 8, in3), dtype=jnp.float32).astype(jnp.bfloat16)

    y3 = linear_forward_torch_layout(x3, weight3, tn_max=128, tk_max=128)
    jax.block_until_ready(y3)
    y3_ref = jnp.einsum("bsi,oi->bso", x3.astype(jnp.float32),
                        weight3.astype(jnp.float32))
    assert y3.shape == (4, 8, out3)
    assert y3.dtype == jnp.bfloat16
    assert jnp.allclose(y3.astype(jnp.float32), y3_ref, atol=5e-2, rtol=5e-2)

    print("KERNEL_OK")
</pallas_src>

<mosaic_0001>
module attributes {stable_mosaic.version = 11 : i64} {
  func.func @_linear_kernel_f32(%arg0: i32, %arg1: i32, %arg2: i32, %arg3: memref<16x128xf32, #tpu.memory_space<vmem>>, %arg4: memref<128x128xf32, #tpu.memory_space<vmem>>, %arg5: memref<16x128xf32, #tpu.memory_space<vmem>>) attributes {dimension_semantics = [#tpu.dimension_semantics<parallel>, #tpu.dimension_semantics<parallel>, #tpu.dimension_semantics<arbitrary>], iteration_bounds = array<i64: 1, 1, 1>, scalar_prefetch = 0 : i64, scratch_operands = 0 : i64, tpu.core_type = #tpu.core_type<tc>, window_params = [{transform_indices = @transform_0, window_bounds = array<i64: 16, 128>}, {transform_indices = @transform_1, window_bounds = array<i64: 128, 128>}, {transform_indices = @transform_2, window_bounds = array<i64: 16, 128>}]} {
    %c0_i32 = arith.constant 0 : i32
    %0 = arith.cmpi eq, %arg2, %c0_i32 : i32
    %1 = arith.extui %0 : i1 to i32
    %c0_i32_0 = arith.constant 0 : i32
    %2 = arith.cmpi ne, %1, %c0_i32_0 : i32
    scf.if %2 {
      %cst_8 = arith.constant 0.000000e+00 : f32
      %9 = vector.broadcast %cst_8 : f32 to vector<16x128xf32>
      %c0_9 = arith.constant 0 : index
      %c0_10 = arith.constant 0 : index
      %10 = vector.load %arg5[%c0_9, %c0_10] : memref<16x128xf32, #tpu.memory_space<vmem>>, vector<16x128xf32>
      tpu.vector_store %arg5[%c0_9, %c0_10], %9 {strides = array<i32>} : memref<16x128xf32, #tpu.memory_space<vmem>>, vector<16x128xf32>,
    } else {
    }
    %c0 = arith.constant 0 : index
    %c0_1 = arith.constant 0 : index
    %3 = vector.load %arg5[%c0, %c0_1] : memref<16x128xf32, #tpu.memory_space<vmem>>, vector<16x128xf32>
    %c0_2 = arith.constant 0 : index
    %c0_3 = arith.constant 0 : index
    %4 = vector.load %arg3[%c0_2, %c0_3] : memref<16x128xf32, #tpu.memory_space<vmem>>, vector<16x128xf32>
    %c0_4 = arith.constant 0 : index
    %c0_5 = arith.constant 0 : index
    %5 = vector.load %arg4[%c0_4, %c0_5] : memref<128x128xf32, #tpu.memory_space<vmem>>, vector<128x128xf32>
    %cst = arith.constant dense<0.000000e+00> : vector<16x128xf32>
    %6 = tpu.matmul %4, %5, %cst {dimension_numbers = #tpu.dot_dimension_numbers<[1], [0], [0], [1], [0, 0, 1, 1], [], []>} : vector<16x128xf32>, vector<128x128xf32>, vector<16x128xf32> -> vector<16x128xf32>
    %7 = arith.addf %3, %6 : vector<16x128xf32>
    %c0_6 = arith.constant 0 : index
    %c0_7 = arith.constant 0 : index
    %8 = vector.load %arg5[%c0_6, %c0_7] : memref<16x128xf32, #tpu.memory_space<vmem>>, vector<16x128xf32>
    tpu.vector_store %arg5[%c0_6, %c0_7], %7 {strides = array<i32>} : memref<16x128xf32, #tpu.memory_space<vmem>>, vector<16x128xf32>,
    return
  }
  func.func @transform_0(%arg0: i32, %arg1: i32, %arg2: i32) -> (i32, i32) {
    %c0_i32 = arith.constant 0 : i32
    return %arg0, %arg2 : i32, i32
  }
  func.func @transform_1(%arg0: i32, %arg1: i32, %arg2: i32) -> (i32, i32) {
    %c0_i32 = arith.constant 0 : i32
    return %arg2, %arg1 : i32, i32
  }
  func.func @transform_2(%arg0: i32, %arg1: i32, %arg2: i32) -> (i32, i32) {
    %c0_i32 = arith.constant 0 : i32
    return %arg0, %arg1 : i32, i32
  }
}

</mosaic_0001>

<bundles_post_ra>
// kernel: tpu_custom_call.1
= control target key start
LH: loop header
LB: loop body
LE: loop exit
PB: predicated region body
PF: predicated region fallthrough
CT: control target
= control target key end

     0   :  { %7 = vsyncpa [#allocation3], 0  ;;  %s391_s0 = inlined_call_operand.hbm [shape: f32[16,128], index: 0, kind: input, shape index: {}]   ;;  %s392_s1 = inlined_call_operand.hbm [shape: f32[128,128], index: 1, kind: input, shape index: {}]   ;;  %s393_s2 = inlined_call_operand.hbm [shape: f32[16,128], index: 2, kind: output, shape index: {}]  }
   0x1   :  { %8 = vsyncpa [#allocation6], 0 }
   0x2   :  { %9 = vsyncpa [#allocation4], 0  ;;  %s326_s9 = smov [#allocation2]   ;;  %s254_s13 = scalar_lea.hbm %s391_s0, 256 }
   0x3   :  { %s15_s10 = sshll.u32 %s326_s9, 4  ;;  %p255_p0 = scmp.ne.s32.totalorder %s391_s0, %s254_s13  ;;  %s16_s10 = int_to_ptr.vmem [resolvable:$true] %s15_s10 }
   0x4   :  { %p258_p1 = scmp.lt.u32.totalorder %s254_s13, %s391_s0 }
   0x6   :  { %p260_p2 = pnand %p258_p1, %p255_p0 }
   0x8   :  { %263 = shalt.err (!%p260_p2)
}
   0x9   :  { %s264_s18 = scalar_lea.vmem %s16_s10, 256  ;;  %p269_p4 = scmp.lt.s32.totalorder %s16_s10, %s16_s10 }
   0xa   :  { %p265_p3 = scmp.ne.s32.totalorder %s16_s10, %s264_s18  ;;  %p270_p5 = scmp.lt.s32.totalorder %s264_s18, %s264_s18 }
   0xc   :  { %p271_p6 = por %p270_p5, %p269_p4 }
   0xe   :  { %p272_p7 = pnand %p271_p6, %p265_p3 }
  0x10   :  { %275 = shalt.err (!%p272_p7)
}
  0x11   :  { %s327_s19 = smov 128   ;;  %s328_s20 = smov 8  }
  0x12   :  { %21 = dma.hbm_to_vmem [thread:$0]  %s391_s0, 256, %s16_s10, [#allocation3], %s327_s19, %s327_s19, %s328_s20  }
  0x13   :  { %s329_s23 = smov [#allocation5]   ;;  %s276_s27 = scalar_lea.hbm %s392_s1, 2048 }
  0x14   :  { %s27_s24 = sshll.u32 %s329_s23, 4  ;;  %p277_p8 = scmp.ne.s32.totalorder %s392_s1, %s276_s27  ;;  %s28_s24 = int_to_ptr.vmem [resolvable:$true] %s27_s24 }
  0x15   :  { %p280_p9 = scmp.lt.u32.totalorder %s276_s27, %s392_s1 }
  0x17   :  { %p282_p10 = pnand %p280_p9, %p277_p8 }
  0x19   :  { %285 = shalt.err (!%p282_p10)
}
  0x1a   :  { %s286_s4 = scalar_lea.vmem %s28_s24, 2048  ;;  %p291_p12 = scmp.lt.s32.totalorder %s28_s24, %s28_s24 }
  0x1b   :  { %p287_p11 = scmp.ne.s32.totalorder %s28_s24, %s286_s4  ;;  %p292_p13 = scmp.lt.s32.totalorder %s286_s4, %s286_s4 }
  0x1d   :  { %p293_p0 = por %p292_p13, %p291_p12 }
  0x1f   :  { %p294_p1 = pnand %p293_p0, %p287_p11 }
  0x21   :  { %297 = shalt.err (!%p294_p1)
}
  0x22   :  { %33 = dma.hbm_to_vmem [thread:$0]  %s392_s1, 2048, %s28_s24, [#allocation6], %s327_s19, %s327_s19, %s328_s20  }
  0x23   :  { %320 = dma.done.wait [#allocation3], 256  }
  0x24   :  { %321 = vsyncadd [#allocation3], 4294967040 }
  0x25   :  { %322 = dma.done.wait [#allocation6], 2048  }
  0x26   :  { %323 = vsyncadd [#allocation6], 4294965248  ;;  %v50_v0 = vld [vmem:[#allocation5] sm:$0xff]  ;;  %v51_v1 = vld [vmem:[#allocation5 + $0x8] sm:$0xff]  ;;  %s330_s1 = smov [#allocation7]  }
  0x27   :  { %v52_v2 = vld [vmem:[#allocation5 + $0x10] sm:$0xff]  ;;  %v216_v3 = vpack.c.bf16 %v51_v1, %v50_v0  ;;  %v53_v4 = vld [vmem:[#allocation5 + $0x18] sm:$0xff]  ;;  %v54_v6 = vld [vmem:[#allocation5 + $0x20] sm:$0xff]  ;;  %s150_s6 = sshll.u32 %s330_s1, 4  ;;  %s151_s6 = int_to_ptr.vmem [resolvable:$true] %s150_s6 }
  0x28   :  { %v220_v5 = vpack.c.bf16 %v53_v4, %v52_v2  ;;  %v55_v7 = vld [vmem:[#allocation5 + $0x28] sm:$0xff]  ;;  %v48_v9 = vld [vmem:[#allocation2] sm:$0xff]  ;;  %v57_v11 = vld [vmem:[#allocation5 + $0x38] sm:$0xff]  ;;  %s298_s7 = scalar_lea.vmem %s151_s6, 256  ;;  %p303_p3 = scmp.lt.s32.totalorder %s151_s6, %s151_s6 }
  0x29   :  { %217 = vmatprep.subr.bf16.mxu0 %v216_v3  ;;  %v224_v8 = vpack.c.bf16 %v55_v7, %v54_v6  ;;  %v56_v10 = vld [vmem:[#allocation5 + $0x30] sm:$0xff]  ;;  %213 = vmatprep.mubr.f32.mxu0 %v48_v9  ;;  %v58_v13 = vld [vmem:[#allocation5 + $0x40] sm:$0xff]  ;;  %v59_v14 = vld [vmem:[#allocation5 + $0x48] sm:$0xff]  ;;  %p299_p2 = scmp.ne.s32.totalorder %s151_s6, %s298_s7  ;;  %p304_p4 = scmp.lt.s32.totalorder %s298_s7, %s298_s7 }
  0x2a   :  { %219 = vmatpush3.bf16.msra.mxu0 %v216_v3  ;;  %v228_v12 = vpack.c.bf16 %v57_v11, %v56_v10  ;;  %v232_v15 = vpack.c.bf16 %v59_v14, %v58_v13  ;;  %v60_v16 = vld [vmem:[#allocation5 + $0x50] sm:$0xff]  ;;  %v61_v17 = vld [vmem:[#allocation5 + $0x58] sm:$0xff]  ;;  %v62_v19 = vld [vmem:[#allocation5 + $0x60] sm:$0xff] }
  0x2b   :  { %221 = vmatprep.subr.bf16.mxu0 %v220_v5  ;;  %v236_v18 = vpack.c.bf16 %v61_v17, %v60_v16  ;;  %v63_v20 = vld [vmem:[#allocation5 + $0x68] sm:$0xff]  ;;  %v64_v22 = vld [vmem:[#allocation5 + $0x70] sm:$0xff]  ;;  %v65_v23 = vld [vmem:[#allocation5 + $0x78] sm:$0xff]  ;;  %p305_p5 = por %p304_p4, %p303_p3 }
  0x2c   :  { %v240_v21 = vpack.c.bf16 %v63_v20, %v62_v19  ;;  %v244_v24 = vpack.c.bf16 %v65_v23, %v64_v22  ;;  %v49_v25 = vld [vmem:[#allocation2 + $0x8] sm:$0xff] }
  0x2d   :  { %p306_p6 = pnand %p305_p5, %p299_p2 }
  0x2e   :  { %223 = vmatpush3.bf16.msra.mxu0 %v220_v5 }
  0x2f   :  { %225 = vmatprep.subr.bf16.mxu0 %v224_v8 }
  0x32   :  { %227 = vmatpush3.bf16.msra.mxu0 %v224_v8 }
  0x33   :  { %229 = vmatprep.subr.bf16.mxu0 %v228_v12 }
  0x36   :  { %231 = vmatpush3.bf16.msra.mxu0 %v228_v12 }
  0x37   :  { %233 = vmatprep.subr.bf16.mxu0 %v232_v15 }
  0x3a   :  { %235 = vmatpush3.bf16.msra.mxu0 %v232_v15 }
  0x3b   :  { %237 = vmatprep.subr.bf16.mxu0 %v236_v18 }
  0x3e   :  { %239 = vmatpush3.bf16.msra.mxu0 %v236_v18 }
  0x3f   :  { %241 = vmatprep.subr.bf16.mxu0 %v240_v21 }
  0x42   :  { %243 = vmatpush3.bf16.msra.mxu0 %v240_v21 }
  0x43   :  { %245 = vmatprep.subr.bf16.mxu0 %v244_v24 }
  0x46   :  { %247 = vmatpush3.bf16.msra.mxu0 %v244_v24 }
  0x49   :  { %214 = vmatmul.mubr.f32.vlgmr.msra.gmra.mrb[0].mxu0 %v49_v25 }
 0x11c   :  { %v215_v26 = vpop.f32.mrb[0].mxu0 }
 0x11d   :  { %v132_v27 = vpop.f32.mrb[1].mxu0  ;;  %144 = vst [vmem:[#allocation7 + $0x8] sm:$0xff] %v215_v26 }
 0x11e   :  { %143 = vst [vmem:[#allocation7] sm:$0xff] %v132_v27 }
 0x11f   :  { %309 = shalt.err (!%p306_p6)
}
 0x120   :  { %s310_s10 = scalar_lea.hbm %s393_s2, 256 }
 0x121   :  { %p311_p7 = scmp.ne.s32.totalorder %s393_s2, %s310_s10  ;;  %p314_p8 = scmp.lt.u32.totalorder %s310_s10, %s393_s2 }
 0x123   :  { %p316_p9 = pnand %p314_p8, %p311_p7 }
 0x125   :  { %319 = shalt.err (!%p316_p9)
}
 0x126   :  { %156 = dma.vmem_to_hbm [thread:$0]  %s151_s6, 256, %s393_s2, [#allocation4], %s327_s19, %s327_s19, %s328_s20  }
 0x127   :  { %324 = dma.done.wait [#allocation4], 256  }
 0x128   :  { %325 = vsyncadd [#allocation4], 4294967040 }
 0x129   :  { %160 = vsyncpa [#allocation3], 1 }
 0x12a   :  { %161 = vsyncpa [#allocation6], 1 }
 0x12b   :  { %162 = vsyncpa [#allocation4], 1 }

</bundles_post_ra>
